<compile_context>
chip_gen: v6e
topology: v6e:2x2x1
jax: 0.10.0
libtpu: 0.0.40
codegen_flags: <defaults>
</compile_context>

<pallas_src>
import functools
import math

import jax
import jax.numpy as jnp
from jax.experimental import pallas as pl
from jax.experimental.pallas import tpu as pltpu


def vdn_sum_kernel(q_ref, o_ref, *, n_agents: int, q_dim: int):
    # q_ref: [TB, A*Q] lane-dense tile; o_ref: [TB, Q].
    # Unrolled static loop over agents -> plain VPU adds on fully packed vregs.
    acc = jnp.zeros(o_ref.shape, jnp.float32)
    for a in range(n_agents):
        acc = acc + q_ref[:, a * q_dim:(a + 1) * q_dim].astype(jnp.float32)
    o_ref[...] = acc.astype(o_ref.dtype)


def vdn_forward(q_values: jax.Array, *, max_tb: int = 1024) -> jax.Array:
    """Pallas equivalent of VDNNet.forward(q_values) = torch.sum(q_values, dim=1)."""
    assert q_values.ndim >= 2, "need at least a reduction axis at dim=1"
    B = q_values.shape[0]
    A = q_values.shape[1]
    tail = q_values.shape[2:]
    Q = math.prod(tail) if tail else 1

    # Lane-dense view: [B, A*Q]. Reduction happens along lane slices inside a row.
    x = q_values.reshape(B, A * Q)

    itemsize = jnp.dtype(q_values.dtype).itemsize
    row_bytes = max(A * Q * itemsize, 1)

    # Pick batch-tile TB: biggest tile that keeps double-buffered DMAs comfortably
    # inside VMEM (works across v5e/v6e/v7x). TB is a multiple of 8 (sublane) unless
    # the whole batch fits in one block (block dim == array dim is always legal).
    target_in_tile_bytes = 8 << 20  # ~8 MiB per input buffer
    tb_cap = max(8, (target_in_tile_bytes // row_bytes) // 8 * 8)
    tb_limit = min(max_tb, tb_cap)
    if B <= tb_limit:
        tb = B
    else:
        tb = tb_limit
    grid = (pl.cdiv(B, tb),)

    in_spec = pl.BlockSpec((tb, A * Q), lambda i: (i, 0))
    out_spec = pl.BlockSpec((tb, Q), lambda i: (i, 0))

    # VMEM budget: double-buffered input + output tiles, plus headroom.
    tile_bytes = 2 * (tb * A * Q + tb * Q) * itemsize
    vmem_limit = int(min(max(2 * tile_bytes, 4 << 20), 100 << 20))

    out2d = pl.pallas_call(
        functools.partial(vdn_sum_kernel, n_agents=A, q_dim=Q),
        out_shape=jax.ShapeDtypeStruct((B, Q), q_values.dtype),
        grid=grid,
        in_specs=[in_spec],
        out_specs=out_spec,
        compiler_params=pltpu.CompilerParams(
            dimension_semantics=("parallel",),
            vmem_limit_bytes=vmem_limit,
        ),
    )(x)
    return out2d.reshape((B,) + tail)


if __name__ == "__main__":
    key = jax.random.PRNGKey(0)

    # Primary small shape consistent with the module: batch=2, n_agents=4, q_dim=128.
    q_values = jax.random.normal(key, (2, 4, 128), dtype=jnp.float32)
    out = jax.block_until_ready(vdn_forward(q_values))
    ref = jnp.sum(q_values, axis=1)
    assert out.shape == ref.shape, (out.shape, ref.shape)
    assert jnp.allclose(out, ref, atol=1e-5, rtol=1e-5)

    # Secondary check exercising the batch grid + ragged final tile.
    key2 = jax.random.PRNGKey(0)
    q_big = jax.random.normal(key2, (1040, 4, 128), dtype=jnp.float32)
    out_big = jax.block_until_ready(vdn_forward(q_big))
    ref_big = jnp.sum(q_big, axis=1)
    assert out_big.shape == ref_big.shape, (out_big.shape, ref_big.shape)
    assert jnp.allclose(out_big, ref_big, atol=1e-5, rtol=1e-5)

    print("KERNEL_OK")
</pallas_src>

<mosaic_0001>
module attributes {stable_mosaic.version = 11 : i64} {
  func.func @vdn_sum_kernel(%arg0: i32, %arg1: memref<2x512xf32, #tpu.memory_space<vmem>>, %arg2: memref<2x128xf32, #tpu.memory_space<vmem>>) attributes {dimension_semantics = [#tpu.dimension_semantics<parallel>], iteration_bounds = array<i64: 1>, scalar_prefetch = 0 : i64, scratch_operands = 0 : i64, tpu.core_type = #tpu.core_type<tc>, window_params = [{transform_indices = @transform_0, window_bounds = array<i64: 2, 512>}, {transform_indices = @transform_1, window_bounds = array<i64: 2, 128>}]} {
    %cst = arith.constant 0.000000e+00 : f32
    %0 = vector.broadcast %cst : f32 to vector<2x128xf32>
    %c0 = arith.constant 0 : index
    %c0_0 = arith.constant 0 : index
    %1 = vector.load %arg1[%c0, %c0_0] : memref<2x512xf32, #tpu.memory_space<vmem>>, vector<2x128xf32>
    %2 = arith.addf %0, %1 : vector<2x128xf32>
    %c0_1 = arith.constant 0 : index
    %c128 = arith.constant 128 : index
    %3 = vector.load %arg1[%c0_1, %c128] : memref<2x512xf32, #tpu.memory_space<vmem>>, vector<2x128xf32>
    %4 = arith.addf %2, %3 : vector<2x128xf32>
    %c0_2 = arith.constant 0 : index
    %c256 = arith.constant 256 : index
    %5 = vector.load %arg1[%c0_2, %c256] : memref<2x512xf32, #tpu.memory_space<vmem>>, vector<2x128xf32>
    %6 = arith.addf %4, %5 : vector<2x128xf32>
    %c0_3 = arith.constant 0 : index
    %c384 = arith.constant 384 : index
    %7 = vector.load %arg1[%c0_3, %c384] : memref<2x512xf32, #tpu.memory_space<vmem>>, vector<2x128xf32>
    %8 = arith.addf %6, %7 : vector<2x128xf32>
    %c0_4 = arith.constant 0 : index
    %c0_5 = arith.constant 0 : index
    %9 = vector.load %arg2[%c0_4, %c0_5] : memref<2x128xf32, #tpu.memory_space<vmem>>, vector<2x128xf32>
    tpu.vector_store %arg2[%c0_4, %c0_5], %8 {strides = array<i32>} : memref<2x128xf32, #tpu.memory_space<vmem>>, vector<2x128xf32>,
    return
  }
  func.func @transform_0(%arg0: i32) -> (i32, i32) {
    %c0_i32 = arith.constant 0 : i32
    %c0_i32_0 = arith.constant 0 : i32
    return %arg0, %c0_i32 : i32, i32
  }
  func.func @transform_1(%arg0: i32) -> (i32, i32) {
    %c0_i32 = arith.constant 0 : i32
    %c0_i32_0 = arith.constant 0 : i32
    return %arg0, %c0_i32 : i32, i32
  }
}

</mosaic_0001>

<bundles_post_ra>
// kernel: tpu_custom_call.1
= control target key start
LH: loop header
LB: loop body
LE: loop exit
PB: predicated region body
PF: predicated region fallthrough
CT: control target
= control target key end

     0   :  { %6 = vsyncpa [#allocation3], 0  ;;  %s109_s0 = inlined_call_operand.hbm [shape: f32[2,512], index: 0, kind: input, shape index: {}]   ;;  %s110_s1 = inlined_call_operand.hbm [shape: f32[2,128], index: 1, kind: output, shape index: {}]  }
   0x1   :  { %7 = vsyncpa [#allocation4], 0  ;;  %s91_s6 = smov [#allocation2]  }
   0x2   :  { %s14_s7 = sshll.u32 %s91_s6, 4  ;;  %s15_s7 = int_to_ptr.vmem [resolvable:$true] %s14_s7 }
   0x3   :  { %s55_s8 = scalar_lea.vmem %s15_s7, 128  ;;  %p60_p1 = scmp.lt.s32.totalorder %s15_s7, %s15_s7 }
   0x4   :  { %p56_p0 = scmp.ne.s32.totalorder %s15_s7, %s55_s8  ;;  %p61_p2 = scmp.lt.s32.totalorder %s55_s8, %s55_s8 }
   0x6   :  { %p62_p3 = por %p61_p2, %p60_p1 }
   0x8   :  { %p63_p4 = pnand %p62_p3, %p56_p0 }
   0xa   :  { %66 = shalt.err (!%p63_p4)
}
   0xb   :  { %17 = dma.hbm_to_vmem [thread:$0]  %s109_s0, 128, %s15_s7, [#allocation3]  }
   0xc   :  { %87 = dma.done.wait [#allocation3], 128  }
   0xd   :  { %88 = vsyncadd [#allocation3], 4294967168  ;;  %v21_v0 = vld [vmem:[#allocation2] sm:$0x3]  ;;  %v23_v1 = vld [vmem:[#allocation2 + $0x2] sm:$0x3] }
   0xe   :  { %v25_v2 = vld [vmem:[#allocation2 + $0x4] sm:$0x3]  ;;  %v24_v3 = vadd.f32 %v23_v1, %v21_v0  ;;  %v27_v4 = vld [vmem:[#allocation2 + $0x6] sm:$0x3]  ;;  %s92_s11 = smov [#allocation5]  }
   0xf   :  { %s36_s12 = sshll.u32 %s92_s11, 4  ;;  %s37_s12 = int_to_ptr.vmem [resolvable:$true] %s36_s12 }
  0x10   :  { %v26_v5 = vadd.f32 %v25_v2, %v24_v3  ;;  %s67_s13 = scalar_lea.vmem %s37_s12, 32  ;;  %p72_p6 = scmp.lt.s32.totalorder %s37_s12, %s37_s12 }
  0x11   :  { %p68_p5 = scmp.ne.s32.totalorder %s37_s12, %s67_s13  ;;  %p73_p7 = scmp.lt.s32.totalorder %s67_s13, %s67_s13 }
  0x12   :  { %v28_v6 = vadd.f32 %v27_v4, %v26_v5 }
  0x13   :  { %p74_p8 = por %p73_p7, %p72_p6 }
  0x14   :  { %29 = vst [vmem:[#allocation5] sm:$0x3] %v28_v6 }
  0x15   :  { %p75_p9 = pnand %p74_p8, %p68_p5 }
  0x17   :  { %78 = shalt.err (!%p75_p9)
}
  0x18   :  { %39 = dma.vmem_to_hbm [thread:$0]  %s37_s12, 32, %s110_s1, [#allocation4]  }
  0x19   :  { %89 = dma.done.wait [#allocation4], 32  }
  0x1a   :  { %90 = vsyncadd [#allocation4], 4294967264 }
  0x1b   :  { %43 = vsyncpa [#allocation3], 1 }
  0x1c   :  { %44 = vsyncpa [#allocation4], 1 }

</bundles_post_ra>
